<compile_context>
chip_gen: v7x
topology: tpu7x:2x2x1
jax: 0.10.0
libtpu: 0.0.40
codegen_flags: <defaults>
</compile_context>

<pallas_src>
import functools

import jax
import jax.numpy as jnp
from jax.experimental import pallas as pl
from jax.experimental.pallas import tpu as pltpu


def _dfxp_quantize(v, qmin, qmax, inv_step, step):
    # step is a power of two, so multiplying by its reciprocal is exact.
    return jnp.clip(jnp.round(v * inv_step), qmin, qmax) * step


def _rescale2d_q_kernel(x_ref, w_ref, b_ref, o_ref, *, qmin, qmax, step, quantize):
    x = x_ref[...]                      # (TM, TN)  activation tile
    w = w_ref[...]                      # (TM, 1)   per-row scale, pre-quantized
    b = b_ref[...]                      # (TM, 1)   per-row bias,  pre-quantized
    if quantize:
        inv_step = 1.0 / step           # compile-time constant
        x = _dfxp_quantize(x, qmin, qmax, inv_step, step)   # ActivationQuantizer
    # GradientQuantizer is identity in the forward pass.
    o_ref[...] = x * w + b              # lane-broadcast of (TM,1) over (TM,TN)


def _pick_tiles(rows, cols, *, max_col_tile=2048, max_row_tile=1024,
                budget_bytes=16 * 1024 * 1024, elem_bytes=4):
    """Pick (row_tile, col_tile): lane-dense column tile (multiple of 128) and a
    row tile (multiple of 8) such that the double-buffered x + out working set
    stays within `budget_bytes` (safe on v5e/v6e/v7x)."""
    col_tile = min(max_col_tile, pl.cdiv(cols, 128) * 128)
    per_row_bytes = col_tile * elem_bytes * 2 * 2   # (x + out) * double buffer
    row_tile = max(8, min(max_row_tile, budget_bytes // per_row_bytes))
    row_tile = (row_tile // 8) * 8
    row_tile = min(row_tile, pl.cdiv(rows, 8) * 8)
    return row_tile, col_tile


def rescale2d_q(x, weight, bias, *, bits=8, step=2.0 ** (-5)):
    """Forward pass of Rescale2d_q.

    x:      (N, C, H, W) float32   (NCHW)
    weight: (C, 1, 1)    float32
    bias:   (C, 1, 1)    float32
    """
    N, C, H, W = x.shape
    HW = H * W
    rows = N * C
    x2 = x.reshape(rows, HW)            # contiguous reshape, no data movement

    qmin = -(2.0 ** (bits - 1))
    qmax = 2.0 ** (bits - 1) - 1
    quantize = bits < 32

    # Quantize weight/bias once here (only C values) -> kernel sees them ready.
    w1 = weight.reshape(C)
    b1 = bias.reshape(C)
    if quantize:
        inv_step = 1.0 / step
        w1 = _dfxp_quantize(w1, qmin, qmax, inv_step, step)   # WeightQuantizer (weight)
        b1 = _dfxp_quantize(b1, qmin, qmax, inv_step, step)   # WeightQuantizer (bias)
    # Per-row scale/bias: channel c repeats for every batch element (glue only,
    # rows values total — negligible HBM traffic next to x).
    w2 = jnp.broadcast_to(w1[None, :], (N, C)).reshape(rows, 1)
    b2 = jnp.broadcast_to(b1[None, :], (N, C)).reshape(rows, 1)

    row_tile, col_tile = _pick_tiles(rows, HW)
    grid = (pl.cdiv(rows, row_tile), pl.cdiv(HW, col_tile))

    kernel = functools.partial(
        _rescale2d_q_kernel, qmin=qmin, qmax=qmax, step=step, quantize=quantize
    )

    out2 = pl.pallas_call(
        kernel,
        out_shape=jax.ShapeDtypeStruct((rows, HW), x.dtype),
        grid_spec=pltpu.PrefetchScalarGridSpec(
            num_scalar_prefetch=0,
            grid=grid,
            in_specs=[
                pl.BlockSpec((row_tile, col_tile), lambda i, j: (i, j)),
                # Same block index across j (the innermost grid dim) => Pallas
                # keeps the (row_tile, 1) scale/bias slices resident while the
                # column sweep runs (no re-DMA).
                pl.BlockSpec((row_tile, 1), lambda i, j: (i, 0)),
                pl.BlockSpec((row_tile, 1), lambda i, j: (i, 0)),
            ],
            out_specs=pl.BlockSpec((row_tile, col_tile), lambda i, j: (i, j)),
        ),
        compiler_params=pltpu.CompilerParams(
            dimension_semantics=("parallel", "parallel"),
            vmem_limit_bytes=32 * 1024 * 1024,
        ),
    )(x2, w2, b2)

    return out2.reshape(N, C, H, W)


def rescale2d_q_ref(x, weight, bias, *, bits=8, step=2.0 ** (-5)):
    """Pure-JAX reference mirroring the PyTorch forward."""
    qmin = -(2.0 ** (bits - 1))
    qmax = 2.0 ** (bits - 1) - 1
    if bits < 32:
        inv_step = 1.0 / step
        xq = _dfxp_quantize(x, qmin, qmax, inv_step, step)
        wq = _dfxp_quantize(weight, qmin, qmax, inv_step, step)
        bq = _dfxp_quantize(bias, qmin, qmax, inv_step, step)
    else:
        xq, wq, bq = x, weight, bias
    return xq * wq[None, :, :, :] + bq[None, :, :, :]


def _run_case(key, N, C, H, W, bits):
    kx, kw, kb = jax.random.split(key, 3)
    x = jax.random.normal(kx, (N, C, H, W), dtype=jnp.float32) * 2.0
    # Module __init__: weight <- ones, bias <- zeros (shape (C,1,1)). Add a small
    # deterministic perturbation so the quantization path is exercised nontrivially.
    weight = jnp.ones((C, 1, 1), jnp.float32) + 0.25 * jax.random.normal(kw, (C, 1, 1))
    bias = jnp.zeros((C, 1, 1), jnp.float32) + 0.25 * jax.random.normal(kb, (C, 1, 1))

    out = rescale2d_q(x, weight, bias, bits=bits)
    out = jax.block_until_ready(out)

    ref = rescale2d_q_ref(x, weight, bias, bits=bits)
    assert out.shape == (N, C, H, W)
    assert jnp.allclose(out, ref, atol=1e-6, rtol=1e-6), "mismatch vs reference"


if __name__ == "__main__":
    key = jax.random.PRNGKey(0)
    k1, k2, k3 = jax.random.split(key, 3)

    # Case 1: small, lane-aligned spatial extent.
    _run_case(k1, N=2, C=4, H=16, W=16, bits=8)
    # Case 2: spatial extent not a multiple of 128 and rows not a multiple of 8
    # (exercises cdiv grid with padded edge blocks).
    _run_case(k2, N=2, C=3, H=14, W=14, bits=8)
    # Case 3: bits=32 path (pure rescale, no quantization).
    _run_case(k3, N=2, C=4, H=16, W=16, bits=32)

    print("KERNEL_OK")
</pallas_src>

<mosaic_0001>
module attributes {stable_mosaic.version = 11 : i64} {
  func.func @_rescale2d_q_kernel(%arg0: i32, %arg1: i32, %arg2: memref<8x256xf32, #tpu.memory_space<vmem>>, %arg3: memref<8x1xf32, #tpu.memory_space<vmem>>, %arg4: memref<8x1xf32, #tpu.memory_space<vmem>>, %arg5: memref<8x256xf32, #tpu.memory_space<vmem>>) attributes {dimension_semantics = [#tpu.dimension_semantics<parallel>, #tpu.dimension_semantics<parallel>], iteration_bounds = array<i64: 1, 1>, scalar_prefetch = 0 : i64, scratch_operands = 0 : i64, tpu.core_type = #tpu.core_type<tc>, window_params = [{transform_indices = @transform_0, window_bounds = array<i64: 8, 256>}, {transform_indices = @transform_1, window_bounds = array<i64: 8, 1>}, {transform_indices = @transform_2, window_bounds = array<i64: 8, 1>}, {transform_indices = @transform_3, window_bounds = array<i64: 8, 256>}]} {
    %c0 = arith.constant 0 : index
    %c0_0 = arith.constant 0 : index
    %0 = vector.load %arg2[%c0, %c0_0] : memref<8x256xf32, #tpu.memory_space<vmem>>, vector<8x256xf32>
    %c0_1 = arith.constant 0 : index
    %c0_2 = arith.constant 0 : index
    %1 = vector.load %arg3[%c0_1, %c0_2] : memref<8x1xf32, #tpu.memory_space<vmem>>, vector<8x1xf32>
    %c0_3 = arith.constant 0 : index
    %c0_4 = arith.constant 0 : index
    %2 = vector.load %arg4[%c0_3, %c0_4] : memref<8x1xf32, #tpu.memory_space<vmem>>, vector<8x1xf32>
    %cst = arith.constant 3.200000e+01 : f32
    %3 = vector.broadcast %cst : f32 to vector<8x256xf32>
    %4 = arith.mulf %0, %3 : vector<8x256xf32>
    %5 = math.roundeven %4 : vector<8x256xf32>
    %cst_5 = arith.constant -1.280000e+02 : f32
    %cst_6 = arith.constant 1.270000e+02 : f32
    %6 = vector.broadcast %cst_5 : f32 to vector<8x256xf32>
    %7 = arith.maximumf %6, %5 : vector<8x256xf32>
    %8 = vector.broadcast %cst_6 : f32 to vector<8x256xf32>
    %9 = arith.minimumf %8, %7 : vector<8x256xf32>
    %cst_7 = arith.constant 3.125000e-02 : f32
    %10 = vector.broadcast %cst_7 : f32 to vector<8x256xf32>
    %11 = arith.mulf %9, %10 : vector<8x256xf32>
    %12 = vector.broadcast %1 : vector<8x1xf32> to vector<8x256xf32>
    %13 = arith.mulf %11, %12 : vector<8x256xf32>
    %14 = vector.broadcast %2 : vector<8x1xf32> to vector<8x256xf32>
    %15 = arith.addf %13, %14 : vector<8x256xf32>
    %c0_8 = arith.constant 0 : index
    %c0_9 = arith.constant 0 : index
    %16 = vector.load %arg5[%c0_8, %c0_9] : memref<8x256xf32, #tpu.memory_space<vmem>>, vector<8x256xf32>
    tpu.vector_store %arg5[%c0_8, %c0_9], %15 {strides = array<i32>} : memref<8x256xf32, #tpu.memory_space<vmem>>, vector<8x256xf32>,
    return
  }
  func.func @transform_0(%arg0: i32, %arg1: i32) -> (i32, i32) {
    %c0_i32 = arith.constant 0 : i32
    return %arg0, %arg1 : i32, i32
  }
  func.func @transform_1(%arg0: i32, %arg1: i32) -> (i32, i32) {
    %c0_i32 = arith.constant 0 : i32
    %c0_i32_0 = arith.constant 0 : i32
    return %arg0, %c0_i32 : i32, i32
  }
  func.func @transform_2(%arg0: i32, %arg1: i32) -> (i32, i32) {
    %c0_i32 = arith.constant 0 : i32
    %c0_i32_0 = arith.constant 0 : i32
    return %arg0, %c0_i32 : i32, i32
  }
  func.func @transform_3(%arg0: i32, %arg1: i32) -> (i32, i32) {
    %c0_i32 = arith.constant 0 : i32
    return %arg0, %arg1 : i32, i32
  }
}

</mosaic_0001>

<bundles_post_ra>
// kernel: tpu_custom_call.1
= control target key start
LH: loop header
LB: loop body
LE: loop exit
PB: predicated region body
PF: predicated region fallthrough
CT: control target
= control target key end

     0   :  { %v88_v1 = vmov 0   ;;  %s134_s0 = inlined_call_operand.vmem [shape: f32[8,256], index: 0, kind: input, shape index: {}]   ;;  %s135_s1 = inlined_call_operand.vmem [shape: f32[8,1], index: 1, kind: input, shape index: {}]   ;;  %s136_s2 = inlined_call_operand.vmem [shape: f32[8,1], index: 2, kind: input, shape index: {}]   ;;  %s137_s3 = inlined_call_operand.hbm [shape: f32[8,256], index: 3, kind: output, shape index: {}]  }
   0x1   :  { %v17_v0 = vld [vmem:[%s135_s1] sm:$0xff]  ;;  %63 = vset.pattern.permute.xlu0 %v88_v1 }
   0x2   :  { %8 = vsyncpa [#allocation3], 0  ;;  %31 = vperm.xlu0 %63, %v17_v0   ;;  %v18_v2 = vld [vmem:[%s136_s2] sm:$0xff]  ;;  %v16_v4 = vld [vmem:[%s134_s0 + $0x8] sm:$0xff]  ;;  %s89_s1 = smov [#allocation2]  }
   0x3   :  { %v15_v3 = vld [vmem:[%s134_s0] sm:$0xff]  ;;  %v20_v6 = vmul.f32 32.0, %v16_v4  ;;  %s51_s2 = sshll.u32 %s89_s1, 4  ;;  %s52_s2 = int_to_ptr.vmem [resolvable:$true] %s51_s2 }
   0x4   :  { %v19_v5 = vmul.f32 32.0, %v15_v3  ;;  %s64_s0 = scalar_lea.vmem %s52_s2, 256  ;;  %p69_p1 = scmp.lt.s32.totalorder %s52_s2, %s52_s2 }
   0x5   :  { %v60_v8 = vround.rtne.f32 %v20_v6  ;;  %p65_p0 = scmp.ne.s32.totalorder %s52_s2, %s64_s0  ;;  %p70_p2 = scmp.lt.s32.totalorder %s64_s0, %s64_s0 }
   0x6   :  { %38 = vperm.xlu0 %63, %v18_v2   ;;  %v59_v7 = vround.rtne.f32 %v19_v5 }
   0x7   :  { %v24_v10 = vmax.f32 %v60_v8, -128.0  ;;  %p71_p3 = por %p70_p2, %p69_p1 }
   0x8   :  { %v23_v9 = vmax.f32 %v59_v7, -128.0 }
   0x9   :  { %v26_v12 = vmin.f32 %v24_v10, 127.0  ;;  %p72_p4 = pnand %p71_p3, %p65_p0 }
   0xa   :  { %v25_v11 = vmin.f32 %v23_v9, 127.0 }
   0xb   :  { %v28_v14 = vmul.f32 0.03125, %v26_v12 }
   0xc   :  { %v27_v13 = vmul.f32 0.03125, %v25_v11 }
  0x81   :  { %v32_v15 = vpop.permute.xlu0 %31 }
  0x82   :  { %v34_v16 = vmul.f32 %v32_v15, %v27_v13  ;;  %v35_v17 = vmul.f32 %v32_v15, %v28_v14 }
  0x85   :  { %v39_v18 = vpop.permute.xlu0 %38 }
  0x86   :  { %v41_v19 = vadd.f32 %v39_v18, %v34_v16  ;;  %v42_v20 = vadd.f32 %v39_v18, %v35_v17 }
  0x88   :  { %43 = vst [vmem:[#allocation2] sm:$0xff] %v41_v19  ;;  %44 = vst [vmem:[#allocation2 + $0x8] sm:$0xff] %v42_v20 }
  0x89   :  { %75 = shalt.err (!%p72_p4)
}
  0x8a   :  { %s76_s22 = scalar_lea.hbm %s137_s3, 256 }
  0x8b   :  { %p77_p5 = scmp.ne.s32.totalorder %s137_s3, %s76_s22  ;;  %p80_p6 = scmp.lt.u32.totalorder %s76_s22, %s137_s3 }
  0x8d   :  { %p82_p7 = pnand %p80_p6, %p77_p5 }
  0x8f   :  { %85 = shalt.err (!%p82_p7)
}
  0x90   :  { %54 = dma.vmem_to_hbm [thread:$0]  %s52_s2, 256, %s137_s3, [#allocation3]  }
  0x91   :  { %86 = dma.done.wait [#allocation3], 256  }
  0x92   :  { %87 = vsyncadd [#allocation3], 4294967040 }
  0x93   :  { %58 = vsyncpa [#allocation3], 1 }

</bundles_post_ra>
